<compile_context>
chip_gen: v7x
topology: tpu7x:2x2x1
jax: 0.10.0
libtpu: 0.0.40
codegen_flags: <defaults>
</compile_context>

<pallas_src>
import functools

import jax
import jax.numpy as jnp
from jax.experimental import pallas as pl
from jax.experimental.pallas import tpu as pltpu


# ----------------------------- configuration -------------------------------
CFG = {
    "model_params": {
        "history_num_frames": 3,   # -> num_history_channels = 8
        "future_num_frames": 8,    # -> num_targets = 16
    }
}
NUM_MODES = 3
BACKBONE_NAME = "efficientnet_b3"
BACKBONE_OUT = {"efficientnet_b0": 1280, "efficientnet_b1": 1280,
                "efficientnet_b3": 1536, "seresnext26d_32x4d": 2048}

NUM_HISTORY_CHANNELS = (CFG["model_params"]["history_num_frames"] + 1) * 2
NUM_IN_CHANNELS = 3 + NUM_HISTORY_CHANNELS                 # 11
FUTURE_LEN = CFG["model_params"]["future_num_frames"]      # 8
NUM_TARGETS = 2 * FUTURE_LEN                               # 16
NUM_PREDS = NUM_TARGETS * NUM_MODES                        # 48
BACKBONE_FEAT = BACKBONE_OUT[BACKBONE_NAME]                # 1536

STEM_OUT = 40          # efficientnet_b3 conv_stem out_channels
STEM_K = 3
STEM_STRIDE = 2
STEM_PAD = 1

KDIM = STEM_K * STEM_K * NUM_IN_CHANNELS                   # 99
OUT_DIM = NUM_PREDS + NUM_MODES                            # 51


def _round_up(x, m):
    return (x + m - 1) // m * m


def _cdiv(a, b):
    return (a + b - 1) // b


# lane-dense padded dims (multiples of 128)
KDIM_PAD = _round_up(KDIM, 128)                            # 128
C_PAD = _round_up(STEM_OUT, 128)                           # 128
OUT_PAD = _round_up(OUT_DIM, 128)                          # 128

# total patch rows (M of the stem matmul) targeted per grid step
ROWS_PER_STEP = 8192


def _detect_silu_dtype():
    """bf16 SiLU epilogue on chips with a bf16 VPU/EUP (v6e, v7x); f32 on v5e."""
    try:
        kind = jax.devices()[0].device_kind.lower()
    except Exception:
        return jnp.float32
    if any(tag in kind for tag in ("v6", "v7", "trillium", "ironwood")):
        return jnp.bfloat16
    return jnp.float32


_SILU_DTYPE = _detect_silu_dtype()


# ----------------------------- Pallas kernel --------------------------------
def _fused_kernel(p_ref, ws_ref, wp_ref, wl_ref, bl_ref, o_ref, acc_ref,
                  *, gb, tile_hw, inv_hw, silu_dtype):
    """Fused stem-conv + SiLU + global-avg-pool + trunk proj + head + softmax.

    grid = (batch_group, n_hw_tiles).  The (gb, C_PAD) f32 VMEM scratch holds
    per-batch-element partial pooling sums across the spatial ("arbitrary")
    axis; the last spatial step finalizes the trunk/head for all gb elements
    at once and writes gb real rows into the (8, OUT_PAD) output block.
    """
    h = pl.program_id(1)
    last_h = pl.num_programs(1) - 1

    @pl.when(h == 0)
    def _init():
        acc_ref[...] = jnp.zeros_like(acc_ref)
        o_ref[...] = jnp.zeros_like(o_ref)

    # --- stem conv: one im2col matmul over all gb*tile_hw patch rows (bf16
    #     operands, f32 MXU accumulation), then SiLU.
    patch = p_ref[...].reshape(gb * tile_hw, KDIM_PAD)          # bf16
    stem = jnp.dot(patch, ws_ref[...], preferred_element_type=jnp.float32)
    s = stem.astype(silu_dtype)
    act = (s * jax.nn.sigmoid(s)).astype(jnp.float32)           # SiLU

    # --- per-batch-element partial global-average-pool (f32 accumulation).
    # Zero-padded spatial rows / channels contribute exactly 0 (SiLU(0) == 0).
    parts = [jnp.sum(act[i * tile_hw:(i + 1) * tile_hw], axis=0, keepdims=True)
             for i in range(gb)]
    part = jnp.concatenate(parts, axis=0) if gb > 1 else parts[0]
    acc_ref[...] += part                                        # (gb, C_PAD)

    @pl.when(h == last_h)
    def _finalize():
        pooled = acc_ref[...] * inv_hw                          # (gb, C_PAD)
        if gb < 8:                                              # pad to 8 rows
            pooled = jnp.concatenate(
                [pooled, jnp.zeros((8 - gb, C_PAD), jnp.float32)], axis=0)
        # surrogate trunk: projection to backbone feature dim + SiLU
        feat = jnp.dot(pooled.astype(jnp.bfloat16), wp_ref[...],
                       preferred_element_type=jnp.float32)      # (8, 1536)
        feat = feat * jax.nn.sigmoid(feat)
        # logit head (padded to 128 output lanes) + bias
        logits = jnp.dot(feat.astype(jnp.bfloat16), wl_ref[...],
                         preferred_element_type=jnp.float32) + bl_ref[...]
        # softmax over the NUM_MODES confidence lanes only (per row, f32)
        lane = jax.lax.broadcasted_iota(jnp.int32, logits.shape, 1)
        conf_mask = (lane >= NUM_PREDS) & (lane < NUM_PREDS + NUM_MODES)
        masked = jnp.where(conf_mask, logits, -jnp.inf)
        m = jnp.max(masked, axis=1, keepdims=True)
        e = jnp.exp(masked - m)                                 # exp(-inf)=0
        inv_den = pl.reciprocal(jnp.sum(e, axis=1, keepdims=True), approx=True)
        probs = e * inv_den
        # gb real rows (rest is discarded by the wrapper); full-tile store
        o_ref[0] = jnp.where(conf_mask, probs, logits)          # (8, OUT_PAD)


# ------------------------------ JAX glue -----------------------------------
def extend_first_conv_weight(w_oihw, num_in_channels):
    """Mirror of extend_1st_convw_ch: tile a (O,3,k,k) weight along in-chan."""
    extend_ch = num_in_channels // 3
    rem = num_in_channels - extend_ch * 3
    parts = [w_oihw] * extend_ch
    if rem > 0:
        parts.append(w_oihw[:, :rem, :, :])
    return jnp.concatenate(parts, axis=1)                  # (O, C_in, k, k)


def init_params(key):
    k1, k2, k3, k4 = jax.random.split(key, 4)
    # base "imagenet" stem weight (O, 3, k, k) OIHW, deterministically random
    w_stem_base = 0.05 * jax.random.normal(
        k1, (STEM_OUT, 3, STEM_K, STEM_K), jnp.float32)
    w_stem_oihw = extend_first_conv_weight(w_stem_base, NUM_IN_CHANNELS)
    # match im2col flattening order (kh, kw, c_in) -> (k*k*C_in, O)
    w_stem = jnp.transpose(w_stem_oihw, (2, 3, 1, 0)).reshape(KDIM, STEM_OUT)
    w_stem = jnp.pad(w_stem, ((0, KDIM_PAD - KDIM), (0, C_PAD - STEM_OUT)))

    w_proj = 0.05 * jax.random.normal(k2, (STEM_OUT, BACKBONE_FEAT), jnp.float32)
    w_proj = jnp.pad(w_proj, ((0, C_PAD - STEM_OUT), (0, 0)))

    w_logit = 0.02 * jax.random.normal(k3, (BACKBONE_FEAT, OUT_DIM), jnp.float32)
    w_logit = jnp.pad(w_logit, ((0, 0), (0, OUT_PAD - OUT_DIM)))

    b_logit = 0.01 * jax.random.normal(k4, (1, OUT_DIM), jnp.float32)
    b_logit = jnp.pad(b_logit, ((0, 0), (0, OUT_PAD - OUT_DIM)))

    return dict(
        w_stem=w_stem.astype(jnp.bfloat16),     # (KDIM_PAD, C_PAD)
        w_proj=w_proj.astype(jnp.bfloat16),     # (C_PAD, BACKBONE_FEAT)
        w_logit=w_logit.astype(jnp.bfloat16),   # (BACKBONE_FEAT, OUT_PAD)
        b_logit=b_logit,                        # (1, OUT_PAD) f32
    )


def _pick_group(b):
    """8 batch elements per grid step; B//2 for small B so the 'parallel'
    group axis still has >= 2 iterations (both TensorCores busy on v7x)."""
    if b >= 16:
        return 8
    return max(1, b // 2)


@jax.jit
def lyft_multi_model_forward(x_nchw, params):
    b, _, hgt, wid = x_nchw.shape
    ho = (hgt + 2 * STEM_PAD - STEM_K) // STEM_STRIDE + 1
    wo = (wid + 2 * STEM_PAD - STEM_K) // STEM_STRIDE + 1
    hw = ho * wo

    # batch grouping + spatial tiling (tile chosen to minimize hw_pad waste)
    gb = _pick_group(b)
    n_groups = _cdiv(b, gb)
    b_pad = n_groups * gb
    tile_cap = _round_up(max(256, ROWS_PER_STEP // gb), 8)
    n_hw_steps = max(1, _cdiv(hw, tile_cap))
    tile_hw = _round_up(_cdiv(hw, n_hw_steps), 8)
    hw_pad = tile_hw * n_hw_steps

    # --- bf16-first, fused-pad im2col (one bf16 pass over the input) --------
    xb = x_nchw.astype(jnp.bfloat16)                        # cast first
    x = jnp.transpose(xb, (0, 2, 3, 1))                     # NHWC bf16
    xp = jnp.pad(x, ((0, 0), (STEM_PAD, STEM_PAD), (STEM_PAD, STEM_PAD), (0, 0)))
    cols = [xp[:, kh:kh + STEM_STRIDE * ho:STEM_STRIDE,
               kw:kw + STEM_STRIDE * wo:STEM_STRIDE, :]
            for kh in range(STEM_K) for kw in range(STEM_K)]
    patches = jnp.stack(cols, axis=3).reshape(b, hw, KDIM)  # (B, hw, 99) bf16
    # batch pad + spatial pad + K pad fused into one jnp.pad (still bf16)
    patches = jnp.pad(patches, ((0, b_pad - b), (0, hw_pad - hw),
                                (0, KDIM_PAD - KDIM)))      # (B_pad, hw_pad, 128)

    kernel = functools.partial(_fused_kernel, gb=gb, tile_hw=tile_hw,
                               inv_hw=1.0 / hw, silu_dtype=_SILU_DTYPE)
    grid = (n_groups, n_hw_steps)

    out = pl.pallas_call(
        kernel,
        grid=grid,
        in_specs=[
            # gb batch elements x tile_hw patch rows per step, double-buffered
            pl.BlockSpec((gb, tile_hw, KDIM_PAD), lambda g, h: (g, h, 0)),
            # weights stay VMEM-resident (constant block index)
            pl.BlockSpec((KDIM_PAD, C_PAD), lambda g, h: (0, 0)),
            pl.BlockSpec((C_PAD, BACKBONE_FEAT), lambda g, h: (0, 0)),
            pl.BlockSpec((BACKBONE_FEAT, OUT_PAD), lambda g, h: (0, 0)),
            pl.BlockSpec((1, OUT_PAD), lambda g, h: (0, 0)),
        ],
        out_specs=pl.BlockSpec((1, 8, OUT_PAD), lambda g, h: (g, 0, 0)),
        out_shape=jax.ShapeDtypeStruct((n_groups, 8, OUT_PAD), jnp.float32),
        scratch_shapes=[pltpu.VMEM((gb, C_PAD), jnp.float32)],
        compiler_params=pltpu.CompilerParams(
            dimension_semantics=("parallel", "arbitrary"),
            vmem_limit_bytes=40 * 1024 * 1024,
        ),
    )(patches, params["w_stem"], params["w_proj"], params["w_logit"],
      params["b_logit"])

    # gb real rows per group; strip batch padding
    logits = out[:, :gb, :].reshape(n_groups * gb, OUT_PAD)[:b]
    pred = logits[:, :NUM_PREDS].reshape(b, NUM_MODES, FUTURE_LEN, 2)
    confidences = logits[:, NUM_PREDS:NUM_PREDS + NUM_MODES]
    return pred, confidences


# ------------------------------- main ---------------------------------------
if __name__ == "__main__":
    key = jax.random.PRNGKey(0)
    kx, kp = jax.random.split(key)
    batch = 2
    x = jax.random.normal(kx, (batch, NUM_IN_CHANNELS, 16, 16), jnp.float32)
    params = init_params(kp)

    pred, confidences = lyft_multi_model_forward(x, params)
    pred, confidences = jax.block_until_ready((pred, confidences))

    assert pred.shape == (batch, NUM_MODES, FUTURE_LEN, 2)
    assert confidences.shape == (batch, NUM_MODES)
    assert bool(jnp.all(jnp.isfinite(pred)))
    assert bool(jnp.all(jnp.isfinite(confidences)))
    # approx-reciprocal softmax denominator -> relaxed tolerance on the sum
    assert bool(jnp.allclose(jnp.sum(confidences, axis=1), 1.0, atol=1e-2))
    print("KERNEL_OK")
</pallas_src>

<mosaic_0001>
module attributes {stable_mosaic.version = 11 : i64} {
  func.func @_fused_kernel(%arg0: i32, %arg1: i32, %arg2: memref<1x64x128xbf16, #tpu.memory_space<vmem>>, %arg3: memref<128x128xbf16, #tpu.memory_space<vmem>>, %arg4: memref<128x1536xbf16, #tpu.memory_space<vmem>>, %arg5: memref<1536x128xbf16, #tpu.memory_space<vmem>>, %arg6: memref<1x128xf32, #tpu.memory_space<vmem>>, %arg7: memref<1x8x128xf32, #tpu.memory_space<vmem>>, %arg8: memref<1x128xf32, #tpu.memory_space<vmem>>) attributes {dimension_semantics = [#tpu.dimension_semantics<parallel>, #tpu.dimension_semantics<arbitrary>], iteration_bounds = array<i64: 2, 1>, scalar_prefetch = 0 : i64, scratch_operands = 1 : i64, tpu.core_type = #tpu.core_type<tc>, window_params = [{transform_indices = @transform_0, window_bounds = array<i64: 1, 64, 128>}, {pipeline_mode = #tpu.pipeline_mode<synchronous>, transform_indices = @transform_1, window_bounds = array<i64: 128, 128>}, {pipeline_mode = #tpu.pipeline_mode<synchronous>, transform_indices = @transform_2, window_bounds = array<i64: 128, 1536>}, {pipeline_mode = #tpu.pipeline_mode<synchronous>, transform_indices = @transform_3, window_bounds = array<i64: 1536, 128>}, {pipeline_mode = #tpu.pipeline_mode<synchronous>, transform_indices = @transform_4, window_bounds = array<i64: 1, 128>}, {transform_indices = @transform_5, window_bounds = array<i64: 1, 8, 128>}]} {
    %c0_i32 = arith.constant 0 : i32
    %0 = arith.cmpi eq, %arg1, %c0_i32 : i32
    %1 = arith.extui %0 : i1 to i32
    %c0_i32_0 = arith.constant 0 : i32
    %2 = arith.cmpi ne, %1, %c0_i32_0 : i32
    scf.if %2 {
      %cst_13 = arith.constant 0.000000e+00 : f32
      %21 = vector.broadcast %cst_13 : f32 to vector<1x128xf32>
      %c0_14 = arith.constant 0 : index
      %c0_15 = arith.constant 0 : index
      %22 = vector.load %arg8[%c0_14, %c0_15] : memref<1x128xf32, #tpu.memory_space<vmem>>, vector<1x128xf32>
      tpu.vector_store %arg8[%c0_14, %c0_15], %21 {strides = array<i32>} : memref<1x128xf32, #tpu.memory_space<vmem>>, vector<1x128xf32>,
      %cst_16 = arith.constant 0.000000e+00 : f32
      %23 = vector.broadcast %cst_16 : f32 to vector<1x8x128xf32>
      %c0_17 = arith.constant 0 : index
      %c0_18 = arith.constant 0 : index
      %c0_19 = arith.constant 0 : index
      %24 = vector.load %arg7[%c0_17, %c0_18, %c0_19] : memref<1x8x128xf32, #tpu.memory_space<vmem>>, vector<1x8x128xf32>
      tpu.vector_store %arg7[%c0_17, %c0_18, %c0_19], %23 {strides = array<i32>} : memref<1x8x128xf32, #tpu.memory_space<vmem>>, vector<1x8x128xf32>,
    } else {
    }
    %c0 = arith.constant 0 : index
    %c0_1 = arith.constant 0 : index
    %c0_2 = arith.constant 0 : index
    %3 = vector.load %arg2[%c0, %c0_1, %c0_2] : memref<1x64x128xbf16, #tpu.memory_space<vmem>>, vector<1x64x128xbf16>
    %4 = vector.shape_cast %3 : vector<1x64x128xbf16> to vector<64x128xbf16>
    %c0_3 = arith.constant 0 : index
    %c0_4 = arith.constant 0 : index
    %5 = vector.load %arg3[%c0_3, %c0_4] : memref<128x128xbf16, #tpu.memory_space<vmem>>, vector<128x128xbf16>
    %cst = arith.constant dense<0.000000e+00> : vector<64x128xf32>
    %6 = tpu.matmul %4, %5, %cst {dimension_numbers = #tpu.dot_dimension_numbers<[1], [0], [0], [1], [0, 0, 1, 1], [], []>} : vector<64x128xbf16>, vector<128x128xbf16>, vector<64x128xf32> -> vector<64x128xf32>
    %7 = arith.negf %6 : vector<64x128xf32>
    %8 = math.exp %7 : vector<64x128xf32>
    %cst_5 = arith.constant 1.000000e+00 : f32
    %9 = vector.broadcast %cst_5 : f32 to vector<64x128xf32>
    %10 = arith.addf %9, %8 : vector<64x128xf32>
    %11 = arith.divf %9, %10 : vector<64x128xf32>
    %12 = arith.mulf %6, %11 : vector<64x128xf32>
    %cst_6 = arith.constant dense<0.000000e+00> : vector<128xf32>
    %13 = vector.multi_reduction <add>, %12, %cst_6 [0] : vector<64x128xf32> to vector<128xf32>
    %14 = vector.shape_cast %13 : vector<128xf32> to vector<1x128xf32>
    %c0_7 = arith.constant 0 : index
    %c0_8 = arith.constant 0 : index
    %15 = vector.load %arg8[%c0_7, %c0_8] : memref<1x128xf32, #tpu.memory_space<vmem>>, vector<1x128xf32>
    %16 = arith.addf %15, %14 : vector<1x128xf32>
    %c0_9 = arith.constant 0 : index
    %c0_10 = arith.constant 0 : index
    %17 = vector.load %arg8[%c0_9, %c0_10] : memref<1x128xf32, #tpu.memory_space<vmem>>, vector<1x128xf32>
    tpu.vector_store %arg8[%c0_9, %c0_10], %16 {strides = array<i32>} : memref<1x128xf32, #tpu.memory_space<vmem>>, vector<1x128xf32>,
    %c0_i32_11 = arith.constant 0 : i32
    %18 = arith.cmpi eq, %arg1, %c0_i32_11 : i32
    %19 = arith.extui %18 : i1 to i32
    %c0_i32_12 = arith.constant 0 : i32
    %20 = arith.cmpi ne, %19, %c0_i32_12 : i32
    scf.if %20 {
      %c0_13 = arith.constant 0 : index
      %c0_14 = arith.constant 0 : index
      %21 = vector.load %arg8[%c0_13, %c0_14] : memref<1x128xf32, #tpu.memory_space<vmem>>, vector<1x128xf32>
      %cst_15 = arith.constant 1.562500e-02 : f32
      %22 = vector.broadcast %cst_15 : f32 to vector<1x128xf32>
      %23 = arith.mulf %21, %22 : vector<1x128xf32>
      %cst_16 = arith.constant 0.000000e+00 : f32
      %24 = vector.broadcast %cst_16 : f32 to vector<7x128xf32>
      %25 = tpu.concatenate %23, %24 in 0 : vector<1x128xf32>, vector<7x128xf32> -> vector<8x128xf32>
      %26 = arith.truncf %25 : vector<8x128xf32> to vector<8x128xbf16>
      %c0_17 = arith.constant 0 : index
      %c0_18 = arith.constant 0 : index
      %27 = vector.load %arg4[%c0_17, %c0_18] : memref<128x1536xbf16, #tpu.memory_space<vmem>>, vector<128x1536xbf16>
      %cst_19 = arith.constant dense<0.000000e+00> : vector<8x1536xf32>
      %28 = tpu.matmul %26, %27, %cst_19 {dimension_numbers = #tpu.dot_dimension_numbers<[1], [0], [0], [1], [0, 0, 1, 1], [], []>} : vector<8x128xbf16>, vector<128x1536xbf16>, vector<8x1536xf32> -> vector<8x1536xf32>
      %29 = arith.negf %28 : vector<8x1536xf32>
      %30 = math.exp %29 : vector<8x1536xf32>
      %cst_20 = arith.constant 1.000000e+00 : f32
      %31 = vector.broadcast %cst_20 : f32 to vector<8x1536xf32>
      %32 = arith.addf %31, %30 : vector<8x1536xf32>
      %33 = arith.divf %31, %32 : vector<8x1536xf32>
      %34 = arith.mulf %28, %33 : vector<8x1536xf32>
      %35 = arith.truncf %34 : vector<8x1536xf32> to vector<8x1536xbf16>
      %c0_21 = arith.constant 0 : index
      %c0_22 = arith.constant 0 : index
      %36 = vector.load %arg5[%c0_21, %c0_22] : memref<1536x128xbf16, #tpu.memory_space<vmem>>, vector<1536x128xbf16>
      %cst_23 = arith.constant dense<0.000000e+00> : vector<8x128xf32>
      %37 = tpu.matmul %35, %36, %cst_23 {dimension_numbers = #tpu.dot_dimension_numbers<[1], [0], [0], [1], [0, 0, 1, 1], [], []>} : vector<8x1536xbf16>, vector<1536x128xbf16>, vector<8x128xf32> -> vector<8x128xf32>
      %c0_24 = arith.constant 0 : index
      %c0_25 = arith.constant 0 : index
      %38 = vector.load %arg6[%c0_24, %c0_25] : memref<1x128xf32, #tpu.memory_space<vmem>>, vector<1x128xf32>
      %39 = vector.broadcast %38 : vector<1x128xf32> to vector<8x128xf32>
      %40 = arith.addf %37, %39 : vector<8x128xf32>
      %41 = tpu.iota {dimensions = array<i32: 1>} : vector<8x128xi32>
      %c48_i32 = arith.constant 48 : i32
      %42 = vector.broadcast %c48_i32 : i32 to vector<8x128xi32>
      %43 = arith.cmpi sge, %41, %42 : vector<8x128xi32>
      %c51_i32 = arith.constant 51 : i32
      %44 = vector.broadcast %c51_i32 : i32 to vector<8x128xi32>
      %45 = arith.cmpi slt, %41, %44 : vector<8x128xi32>
      %46 = arith.andi %43, %45 : vector<8x128xi1>
      %cst_26 = arith.constant 0xFF800000 : f32
      %47 = vector.broadcast %cst_26 : f32 to vector<8x128xf32>
      %48 = arith.select %46, %40, %47 : vector<8x128xi1>, vector<8x128xf32>
      %cst_27 = arith.constant dense<0xFF800000> : vector<8xf32>
      %49 = vector.multi_reduction <maximumf>, %48, %cst_27 [1] : vector<8x128xf32> to vector<8xf32>
      %50 = vector.shape_cast %49 : vector<8xf32> to vector<8x1xf32>
      %51 = vector.broadcast %50 : vector<8x1xf32> to vector<8x128xf32>
      %52 = arith.subf %48, %51 : vector<8x128xf32>
      %53 = math.exp %52 : vector<8x128xf32>
      %cst_28 = arith.constant dense<0.000000e+00> : vector<8xf32>
      %54 = vector.multi_reduction <add>, %53, %cst_28 [1] : vector<8x128xf32> to vector<8xf32>
      %55 = vector.shape_cast %54 : vector<8xf32> to vector<8x1xf32>
      %56 = tpu.reciprocal %55 {approx = true} : vector<8x1xf32> -> vector<8x1xf32>
      %57 = vector.broadcast %56 : vector<8x1xf32> to vector<8x128xf32>
      %58 = arith.mulf %53, %57 : vector<8x128xf32>
      %59 = arith.select %46, %58, %40 : vector<8x128xi1>, vector<8x128xf32>
      %c0_29 = arith.constant 0 : index
      %c0_30 = arith.constant 0 : index
      %c0_31 = arith.constant 0 : index
      %60 = vector.load %arg7[%c0_29, %c0_30, %c0_31] : memref<1x8x128xf32, #tpu.memory_space<vmem>>, vector<1x8x128xf32>
      %61 = vector.shape_cast %60 : vector<1x8x128xf32> to vector<8x128xf32>
      %62 = vector.shape_cast %59 : vector<8x128xf32> to vector<1x8x128xf32>
      tpu.vector_store %arg7[%c0_29, %c0_30, %c0_31], %62 {strides = array<i32>} : memref<1x8x128xf32, #tpu.memory_space<vmem>>, vector<1x8x128xf32>,
    } else {
    }
    return
  }
  func.func @transform_0(%arg0: i32, %arg1: i32) -> (i32, i32, i32) {
    %c0_i32 = arith.constant 0 : i32
    %c0_i32_0 = arith.constant 0 : i32
    return %arg0, %arg1, %c0_i32 : i32, i32, i32
  }
  func.func @transform_1(%arg0: i32, %arg1: i32) -> (i32, i32) {
    %c0_i32 = arith.constant 0 : i32
    %c0_i32_0 = arith.constant 0 : i32
    %c0_i32_1 = arith.constant 0 : i32
    return %c0_i32, %c0_i32_0 : i32, i32
  }
  func.func @transform_2(%arg0: i32, %arg1: i32) -> (i32, i32) {
    %c0_i32 = arith.constant 0 : i32
    %c0_i32_0 = arith.constant 0 : i32
    %c0_i32_1 = arith.constant 0 : i32
    return %c0_i32, %c0_i32_0 : i32, i32
  }
  func.func @transform_3(%arg0: i32, %arg1: i32) -> (i32, i32) {
    %c0_i32 = arith.constant 0 : i32
    %c0_i32_0 = arith.constant 0 : i32
    %c0_i32_1 = arith.constant 0 : i32
    return %c0_i32, %c0_i32_0 : i32, i32
  }
  func.func @transform_4(%arg0: i32, %arg1: i32) -> (i32, i32) {
    %c0_i32 = arith.constant 0 : i32
    %c0_i32_0 = arith.constant 0 : i32
    %c0_i32_1 = arith.constant 0 : i32
    return %c0_i32, %c0_i32_0 : i32, i32
  }
  func.func @transform_5(%arg0: i32, %arg1: i32) -> (i32, i32, i32) {
    %c0_i32 = arith.constant 0 : i32
    %c0_i32_0 = arith.constant 0 : i32
    %c0_i32_1 = arith.constant 0 : i32
    return %arg0, %c0_i32, %c0_i32_0 : i32, i32, i32
  }
}

</mosaic_0001>

<bundles_post_ra>
// kernel: lyft_multi_model_forward.1
= control target key start
LH: loop header
LB: loop body
LE: loop exit
PB: predicated region body
PF: predicated region fallthrough
CT: control target
= control target key end

     0   :  { %s3356_s18 = smov 0   ;;  %s3358_s19 = smov 0   ;;  %s4066_s0 = inlined_call_operand.vmem [shape: bf16[2,64,128], index: 0, kind: input, shape index: {}]   ;;  %s4067_s1 = inlined_call_operand.vmem [shape: bf16[128,128], index: 1, kind: input, shape index: {}]   ;;  %s4068_s2 = inlined_call_operand.vmem [shape: bf16[128,1536], index: 2, kind: input, shape index: {}]   ;;  %s4069_s3 = inlined_call_operand.vmem [shape: bf16[1536,128], index: 3, kind: input, shape index: {}]   ;;  %s4070_s4 = inlined_call_operand.vmem [shape: f32[1,128], index: 4, kind: input, shape index: {}]   ;;  %s4071_s5 = inlined_call_operand.vmem [shape: f32[2,8,128], index: 5, kind: output, shape index: {}]  }
   0x1   :  { %s3360_s20 = smov 0  }
   0x2 LB: > { %s27_s21 = sadd.s32 1, %s3318_s19  ;;  %p2520_p0 = scmp.ge.s32.totalorder %s3322_s20, 1  ;;  %s3322_s20 = sphi %s3360_s20, %s15_s20   ;;  %s3318_s19 = sphi %s3358_s19, %s4077_s19   ;;  %s3314_s18 = sphi %s3356_s18, %s4076_s18  }
   0x3   : > { %p29_p1 = scmp.ge.s32.totalorder %s27_s21, 2  ;;  %p206_p2 = scmp.lt.s32.totalorder %s3322_s20, 3 }
   0x5   : > { %s4079_s21 = smov (%p29_p1, %s27_s21), 0  ;;  %p207_p3 = pnand %p2520_p0, %p206_p2 }
   0x6   : > { %v2964_v0 = vld [vmem:[%s4067_s1] sm:$0xff] (!%p207_p3)   ;;  %p238_p4 = scmp.lt.s32.totalorder (!%p207_p3), %s3314_s18, 1  ;;  %v2965_v1 = vld [vmem:[%s4067_s1 + $0x8] sm:$0xff] (!%p207_p3)   ;;  %v2966_v2 = vld [vmem:[%s4067_s1 + $0x10] sm:$0xff] (!%p207_p3)   ;;  %v3324_v16 = vmov (!%p207_p3), 0.0   ;;  %v3325_v43 = vmov (!%p207_p3), 0  }
   0x7   : > { %210 = sbr.rel (%p207_p3) target bundleno = 1165 (0x48d), region = 40  ;;  %2914 = vmatprep.subr.bf16.mxu0 (!%p207_p3), %v2964_v0  ;;  %v2967_v3 = vld [vmem:[%s4067_s1 + $0x18] sm:$0xff] (!%p207_p3)   ;;  %v2968_v5 = vld [vmem:[%s4067_s1 + $0x20] sm:$0xff] (!%p207_p3)   ;;  %v2969_v6 = vld [vmem:[%s4067_s1 + $0x28] sm:$0xff] (!%p207_p3)   ;;  %256 = vst [vmem:[#allocation2] sm:$0x1] (!%p207_p3), %v3324_v16  ;;  %1107 = vmatprep.mubr.bf16.mxu1 (!%p207_p3), %v3325_v43 }
   0x8   : > { %2915 = vmatpush3.bf16.msra.mxu0 (!%p207_p3), %v2964_v0  ;;  %v2970_v7 = vld [vmem:[%s4067_s1 + $0x30] sm:$0xff] (!%p207_p3)   ;;  %v2971_v8 = vld [vmem:[%s4067_s1 + $0x38] sm:$0xff] (!%p207_p3)   ;;  %vm496_vm0 = vcmask (!%p207_p3), 1040384  }
   0x9   : > { %2916 = vmatprep.subr.bf16.mxu0 (!%p207_p3), %v2965_v1  ;;  %v2976_v12 = vld [vmem:[%s4068_s2 + $0x4] ss:$48 sps:$4 sm:$0xff] (!%p207_p3)   ;;  %v2980_v13 = vld [vmem:[%s4068_s2 + $0xc] ss:$48 sps:$4 sm:$0xff] (!%p207_p3)   ;;  %v2978_v14 = vld [vmem:[%s4068_s2 + $0x8] ss:$48 sps:$4 sm:$0xff] (!%p207_p3)  }
   0xa   : > { %v2981_v15 = vld [vmem:[%s4068_s2] ss:$48 sps:$4 sm:$0xff] (!%p207_p3)   ;;  %1075 = vmatprep.subr.bf16.mxu1 (!%p207_p3), %v2976_v12  ;;  %v2982_v17 = vld [vmem:[%s4068_s2 + $0x64] ss:$48 sps:$4 sm:$0xff] (!%p207_p3)   ;;  %v2986_v18 = vld [vmem:[%s4068_s2 + $0x6c] ss:$48 sps:$4 sm:$0xff] (!%p207_p3)  }
   0xb   : > { %1076 = vmatpush1.bf16.msra.mxu1 (!%p207_p3), %v2981_v15  ;;  %v2984_v19 = vld [vmem:[%s4068_s2 + $0x68] ss:$48 sps:$4 sm:$0xff] (!%p207_p3)   ;;  %v2987_v20 = vld [vmem:[%s4068_s2 + $0x60] ss:$48 sps:$4 sm:$0xff] (!%p207_p3)   ;;  %v2988_v21 = vld [vmem:[%s4068_s2 + $0xc4] ss:$48 sps:$4 sm:$0xff] (!%p207_p3)  }
   0xc   : > { %2917 = vmatpush3.bf16.msra.mxu0 (!%p207_p3), %v2965_v1  ;;  %1077 = vmatprep.subr.bf16.mxu1 (!%p207_p3), %v2982_v17  ;;  %v2992_v22 = vld [vmem:[%s4068_s2 + $0xcc] ss:$48 sps:$4 sm:$0xff] (!%p207_p3)   ;;  %v2990_v23 = vld [vmem:[%s4068_s2 + $0xc8] ss:$48 sps:$4 sm:$0xff] (!%p207_p3)   ;;  %v2993_v24 = vld [vmem:[%s4068_s2 + $0xc0] ss:$48 sps:$4 sm:$0xff] (!%p207_p3)  }
   0xd   : > { %2918 = vmatprep.subr.bf16.mxu0 (!%p207_p3), %v2966_v2  ;;  %v2994_v25 = vld [vmem:[%s4068_s2 + $0x124] ss:$48 sps:$4 sm:$0xff] (!%p207_p3)   ;;  %v2998_v26 = vld [vmem:[%s4068_s2 + $0x12c] ss:$48 sps:$4 sm:$0xff] (!%p207_p3)   ;;  %v2996_v27 = vld [vmem:[%s4068_s2 + $0x128] ss:$48 sps:$4 sm:$0xff] (!%p207_p3)  }
   0xe   : > { %s4081_s18 = smov (!%p238_p4, %s3314_s18), 1  ;;  %v2999_v28 = vld [vmem:[%s4068_s2 + $0x120] ss:$48 sps:$4 sm:$0xff]   ;;  %v3000_v29 = vld [vmem:[%s4068_s2 + $0x184] ss:$48 sps:$4 sm:$0xff]   ;;  %vm3514_vm1 = vmpackc.low %vm496_vm0, %vm496_vm0 }
   0xf   : > { %s2769_s28 = sshll.u32 %s4081_s18, 5  ;;  %1078 = vmatpush1.bf16.msra.mxu1 %v2987_v20  ;;  %v3004_v30 = vld [vmem:[%s4068_s2 + $0x18c] ss:$48 sps:$4 sm:$0xff]   ;;  %v3002_v31 = vld [vmem:[%s4068_s2 + $0x188] ss:$48 sps:$4 sm:$0xff]   ;;  %s2523_s29 = sshll.u32 %s4081_s18, 3 }
  0x10   : > { %s245_s6 = scalar_lea.vmem %s4066_s0, %s2769_s28  ;;  %2919 = vmatpush3.bf16.msra.mxu0 %v2966_v2  ;;  %1079 = vmatprep.subr.bf16.mxu1 %v2988_v21  ;;  %v3005_v32 = vld [vmem:[%s4068_s2 + $0x180] ss:$48 sps:$4 sm:$0xff]   ;;  %v3006_v33 = vld [vmem:[%s4068_s2 + $0x1e4] ss:$48 sps:$4 sm:$0xff]   ;;  %v3010_v34 = vld [vmem:[%s4068_s2 + $0x1ec] ss:$48 sps:$4 sm:$0xff]   ;;  %s250_s7 = scalar_lea.vmem %s4071_s5, %s2523_s29 }
  0x11   : > { %v2972_v4 = vld [vmem:[%s245_s6] sm:$0xff]   ;;  %2920 = vmatprep.subr.bf16.mxu0 %v2967_v3  ;;  %v2973_v9 = vld [vmem:[%s245_s6 + $0x8] sm:$0xff]   ;;  %v2974_v10 = vld [vmem:[%s245_s6 + $0x10] sm:$0xff]  }
  0x12   : > { %2930 = vmatprep.mubr.bf16.mxu0 %v2972_v4  ;;  %v2975_v11 = vld [vmem:[%s245_s6 + $0x18] sm:$0xff]   ;;  %v3011_v36 = vld [vmem:[%s4068_s2 + $0x1e0] ss:$48 sps:$4 sm:$0xff]   ;;  %v3012_v37 = vld [vmem:[%s4068_s2 + $0x244] ss:$48 sps:$4 sm:$0xff]  }
  0x13   : > { %1080 = vmatpush1.bf16.msra.mxu1 %v2993_v24  ;;  %v3008_v35 = vld [vmem:[%s4068_s2 + $0x1e8] ss:$48 sps:$4 sm:$0xff]   ;;  %v3016_v39 = vld [vmem:[%s4068_s2 + $0x24c] ss:$48 sps:$4 sm:$0xff]   ;;  %v3017_v40 = vld [vmem:[%s4068_s2 + $0x240] ss:$48 sps:$4 sm:$0xff]  }
  0x14   : > { %2921 = vmatpush3.bf16.msra.mxu0 %v2967_v3  ;;  %1081 = vmatprep.subr.bf16.mxu1 %v2994_v25  ;;  %v3014_v38 = vld [vmem:[%s4068_s2 + $0x248] ss:$48 sps:$4 sm:$0xff]   ;;  %v3018_v41 = vld [vmem:[%s4068_s2 + $0x2a4] ss:$48 sps:$4 sm:$0xff]   ;;  %v3022_v42 = vld [vmem:[%s4068_s2 + $0x2ac] ss:$48 sps:$4 sm:$0xff]  }
  0x15   : > { %2922 = vmatprep.subr.bf16.mxu0 %v2968_v5  ;;  %v3020_v44 = vld [vmem:[%s4068_s2 + $0x2a8] ss:$48 sps:$4 sm:$0xff]   ;;  %v3023_v45 = vld [vmem:[%s4068_s2 + $0x2a0] ss:$48 sps:$4 sm:$0xff]   ;;  %v3026_v46 = vld [vmem:[%s4068_s2 + $0x14] ss:$48 sps:$4 sm:$0xff]  }
  0x16   : > { %v3029_v47 = vld [vmem:[%s4068_s2 + $0x1c] ss:$48 sps:$4 sm:$0xff]  }
  0x17   : > { %1082 = vmatpush1.bf16.msra.mxu1 %v2999_v28 }
  0x18   : > { %2923 = vmatpush3.bf16.msra.mxu0 %v2968_v5  ;;  %1083 = vmatprep.subr.bf16.mxu1 %v3000_v29 }
  0x19   : > { %2924 = vmatprep.subr.bf16.mxu0 %v2969_v6 }
  0x1b   : > { %1084 = vmatpush1.bf16.msra.mxu1 %v3005_v32 }
  0x1c   : > { %2925 = vmatpush3.bf16.msra.mxu0 %v2969_v6  ;;  %1085 = vmatprep.subr.bf16.mxu1 %v3006_v33 }
  0x1d   : > { %2926 = vmatprep.subr.bf16.mxu0 %v2970_v7 }
  0x1f   : > { %1086 = vmatpush1.bf16.msra.mxu1 %v3011_v36 }
  0x20   : > { %2927 = vmatpush3.bf16.msra.mxu0 %v2970_v7  ;;  %1087 = vmatprep.subr.bf16.mxu1 %v3012_v37 }
  0x21   : > { %2928 = vmatprep.subr.bf16.mxu0 %v2971_v8 }
  0x23   : > { %1088 = vmatpush1.bf16.msra.mxu1 %v3017_v40 }
  0x24   : > { %2929 = vmatpush3.bf16.msra.mxu0 %v2971_v8  ;;  %1089 = vmatprep.subr.bf16.mxu1 %v3018_v41 }
  0x25   : > { %1116 = vmatprep.subr.bf16.mxu0 %v2980_v13 }
  0x27   : > { %2931 = vmatmul.mubr.bf16.vlgmr.msra.gmra.mrb[0].mxu0 %v2973_v9  ;;  %1090 = vmatpush1.bf16.msra.mxu1 %v3023_v45  ;;  %v488_v45 = vld [vmem:[#allocation2] sm:$0x1] }
  0x28   : > { %2934 = vmatprep.mubr.bf16.mxu0 %v2974_v10  ;;  %1117 = vmatpush1.bf16.msra.mxu0 %v2978_v14 }
  0x29   : > { %1118 = vmatprep.subr.bf16.mxu0 %v2986_v18  ;;  %1157 = vmatprep.subr.bf16.mxu1 %v3026_v46 }
  0x2c   : > { %1119 = vmatpush1.bf16.msra.mxu0 %v2984_v19 }
  0x2d   : > { %1120 = vmatprep.subr.bf16.mxu0 %v2992_v22 }
  0x2f   : > { %2935 = vmatmul.mubr.bf16.gmra.mrb[4].mxu0 %v2975_v11 }
  0x30   : > { %1121 = vmatpush1.bf16.msra.mxu0 %v2990_v23  ;;  %1148 = vmatprep.mubr.bf16.mxu0 %v3325_v43 }
  0x31   : > { %1122 = vmatprep.subr.bf16.mxu0 %v2998_v26 }
  0x34   : > { %1123 = vmatpush1.bf16.msra.mxu0 %v2996_v27 }
  0x35   : > { %1124 = vmatprep.subr.bf16.mxu0 %v3004_v30 }
  0x38   : > { %1125 = vmatpush1.bf16.msra.mxu0 %v3002_v31 }
  0x39   : > { %1126 = vmatprep.subr.bf16.mxu0 %v3010_v34 }
  0x3c   : > { %1127 = vmatpush1.bf16.msra.mxu0 %v3008_v35 }
  0x3d   : > { %1128 = vmatprep.subr.bf16.mxu0 %v3016_v39 }
  0x40   : > { %1129 = vmatpush1.bf16.msra.mxu0 %v3014_v38 }
  0x41   : > { %1130 = vmatprep.subr.bf16.mxu0 %v3022_v42 }
  0x44   : > { %1131 = vmatpush1.bf16.msra.mxu0 %v3020_v44 }
  0x45   : > { %1198 = vmatprep.subr.bf16.mxu0 %v3029_v47 }
  0xfa   : > { %v2932_v48 = vpop.f32.mrb[0].mxu0 }
  0xfb   : > { %v2538_v49 = vmul.f32 -1.442695, %v2932_v48  ;;  %v388_v50 = vpop.f32.mrb[1].mxu0 }
  0xfc   : > { %v2536_v51 = vmul.f32 -1.442695, %v388_v50  ;;  %v2933_v52 = vpop.f32.mrb[2].mxu0 }
  0xfd   : > { %3216 = vpow2.f32 %v2538_v49  ;;  %v2539_v53 = vmul.f32 -1.442695, %v2933_v52  ;;  %v391_v54 = vpop.f32.mrb[3].mxu0 }
  0xfe   : > { %3218 = vpow2.f32 %v2536_v51  ;;  %v2537_v55 = vmul.f32 -1.442695, %v391_v54  ;;  %v3027_v51 = vld [vmem:[%s4068_s2 + $0x18] ss:$48 sps:$4 sm:$0xff]  }
  0xff   : > { %3220 = vpow2.f32 %v2539_v53 }
 0x100   : > { %3222 = vpow2.f32 %v2537_v55  ;;  %v3035_v55 = vld [vmem:[%s4068_s2 + $0x7c] ss:$48 sps:$4 sm:$0xff]  }
 0x102   : > { %v2936_v56 = vpop.f32.mrb[4].mxu0 }
 0x103   : > { %v2542_v57 = vmul.f32 -1.442695, %v2936_v56  ;;  %v404_v58 = vpop.f32.mrb[5].mxu0 }
 0x104   : > { %v2540_v59 = vmul.f32 -1.442695, %v404_v58  ;;  %v2937_v60 = vpop.f32.mrb[6].mxu0 }
 0x105   : > { %3224 = vpow2.f32 %v2542_v57  ;;  %v2543_v61 = vmul.f32 -1.442695, %v2937_v60  ;;  %v407_v62 = vpop.f32.mrb[7].mxu0  ;;  %v3033_v57 = vld [vmem:[%s4068_s2 + $0x78] ss:$48 sps:$4 sm:$0xff]  }
 0x106   : > { %3226 = vpow2.f32 %v2540_v59  ;;  %v2541_v63 = vmul.f32 -1.442695, %v407_v62  ;;  %v3041_v59 = vld [vmem:[%s4068_s2 + $0xdc] ss:$48 sps:$4 sm:$0xff]  }
 0x107   : > { %v3217_v0 = vpop.eup %3216  ;;  %3228 = vpow2.f32 %v2543_v61  ;;  %v3039_v61 = vld [vmem:[%s4068_s2 + $0xd8] ss:$48 sps:$4 sm:$0xff]  }
 0x108   : > { %v3219_v1 = vpop.eup %3218  ;;  %v445_v2 = vadd.f32 1.0, %v3217_v0  ;;  %3230 = vpow2.f32 %v2541_v63  ;;  %v3047_v63 = vld [vmem:[%s4068_s2 + $0x13c] ss:$48 sps:$4 sm:$0xff]   ;;  %v3042_v0 = vld [vmem:[%s4068_s2 + $0x130] ss:$48 sps:$4 sm:$0xff]  }
 0x109   : > { %v3221_v3 = vpop.eup %3220  ;;  %v443_v4 = vadd.f32 1.0, %v3219_v1  ;;  %v3045_v1 = vld [vmem:[%s4068_s2 + $0x138] ss:$48 sps:$4 sm:$0xff]  }
 0x10a   : > { %v3223_v5 = vpop.eup %3222  ;;  %v446_v6 = vadd.f32 1.0, %v3221_v3  ;;  %v3053_v3 = vld [vmem:[%s4068_s2 + $0x19c] ss:$48 sps:$4 sm:$0xff]  }
 0x10b   : > { %3232 = vrcp.f32 %v443_v4  ;;  %v444_v7 = vadd.f32 1.0, %v3223_v5  ;;  %v3048_v4 = vld [vmem:[%s4068_s2 + $0x190] ss:$48 sps:$4 sm:$0xff]   ;;  %v3051_v5 = vld [vmem:[%s4068_s2 + $0x198] ss:$48 sps:$4 sm:$0xff]  }
 0x10c   : > { %3234 = vrcp.f32 %v445_v2  ;;  %v3050_v2 = vld [vmem:[%s4068_s2 + $0x194] ss:$48 sps:$4 sm:$0xff]  }
 0x10d   : > { %3236 = vrcp.f32 %v444_v7  ;;  %v3059_v7 = vld [vmem:[%s4068_s2 + $0x1fc] ss:$48 sps:$4 sm:$0xff]  }
 0x10e   : > { %3238 = vrcp.f32 %v446_v6  ;;  %v3056_v6 = vld [vmem:[%s4068_s2 + $0x1f4] ss:$48 sps:$4 sm:$0xff]  }
 0x10f   : > { %v3225_v8 = vpop.eup %3224 }
 0x110   : > { %v3227_v9 = vpop.eup %3226  ;;  %v449_v10 = vadd.f32 1.0, %v3225_v8  ;;  %v3054_v8 = vld [vmem:[%s4068_s2 + $0x1f0] ss:$48 sps:$4 sm:$0xff]  }
 0x111   : > { %v3229_v11 = vpop.eup %3228  ;;  %v447_v12 = vadd.f32 1.0, %v3227_v9  ;;  %v3057_v9 = vld [vmem:[%s4068_s2 + $0x1f8] ss:$48 sps:$4 sm:$0xff]  }
 0x112   : > { %v3231_v13 = vpop.eup %3230  ;;  %v450_v14 = vadd.f32 1.0, %v3229_v11  ;;  %v3065_v11 = vld [vmem:[%s4068_s2 + $0x25c] ss:$48 sps:$4 sm:$0xff]  }
 0x113   : > { %3240 = vrcp.f32 %v447_v12  ;;  %v448_v15 = vadd.f32 1.0, %v3231_v13  ;;  %v3060_v12 = vld [vmem:[%s4068_s2 + $0x250] ss:$48 sps:$4 sm:$0xff]   ;;  %v3063_v13 = vld [vmem:[%s4068_s2 + $0x258] ss:$48 sps:$4 sm:$0xff]  }
 0x114   : > { %3242 = vrcp.f32 %v449_v10  ;;  %v3062_v10 = vld [vmem:[%s4068_s2 + $0x254] ss:$48 sps:$4 sm:$0xff]  }
 0x115   : > { %v3233_v16 = vpop.eup %3232  ;;  %3244 = vrcp.f32 %v448_v15  ;;  %v3071_v15 = vld [vmem:[%s4068_s2 + $0x2bc] ss:$48 sps:$4 sm:$0xff]  }
 0x116   : > { %v3235_v17 = vpop.eup %3234  ;;  %3246 = vrcp.f32 %v450_v14  ;;  %v467_v19 = vmul.f32 %v3233_v16, %v388_v50  ;;  %v3024_v50 = vld [vmem:[%s4068_s2 + $0x10] ss:$48 sps:$4 sm:$0xff]   ;;  %v3068_v14 = vld [vmem:[%s4068_s2 + $0x2b4] ss:$48 sps:$4 sm:$0xff]  }
 0x117   : > { %v3237_v18 = vpop.eup %3236  ;;  %v469_v22 = vmul.f32 %v3235_v17, %v2932_v48  ;;  %v3066_v16 = vld [vmem:[%s4068_s2 + $0x2b0] ss:$48 sps:$4 sm:$0xff]   ;;  %v3069_v17 = vld [vmem:[%s4068_s2 + $0x2b8] ss:$48 sps:$4 sm:$0xff]  }
 0x118   : > { %v468_v20 = vmul.f32 %v3237_v18, %v391_v54  ;;  %v3239_v21 = vpop.eup %3238  ;;  %v3032_v54 = vld [vmem:[%s4068_s2 + $0x74] ss:$48 sps:$4 sm:$0xff]  }
 0x119   : > { %v470_v24 = vmul.f32 %v3239_v21, %v2933_v52  ;;  %v3074_v18 = vld [vmem:[%s4068_s2 + $0x24] ss:$48 sps:$4 sm:$0xff]   ;;  %v3075_v21 = vld [vmem:[%s4068_s2 + $0x28] ss:$48 sps:$4 sm:$0xff]  }
 0x11a   : > { %v475_v23 = vadd.f32 %v468_v20, %v467_v19  ;;  %v3077_v19 = vld [vmem:[%s4068_s2 + $0x2c] ss:$48 sps:$4 sm:$0xff]   ;;  %v3072_v20 = vld [vmem:[%s4068_s2 + $0x20] ss:$48 sps:$4 sm:$0xff]  }
 0x11b   : > { %v3124_v52 = vld [vmem:[%s4069_s3 + $0x48] sm:$0xff]  }
 0x11c   : > { %v476_v25 = vadd.f32 %v475_v23, %v469_v22  ;;  %v3080_v22 = vld [vmem:[%s4068_s2 + $0x84] ss:$48 sps:$4 sm:$0xff]   ;;  %v3083_v23 = vld [vmem:[%s4068_s2 + $0x8c] ss:$48 sps:$4 sm:$0xff]  }
 0x11d   : > { %v3241_v26 = vpop.eup %3240 }
 0x11e   : > { %v3243_v27 = vpop.eup %3242  ;;  %v471_v28 = vmul.f32 %v3241_v26, %v404_v58  ;;  %v477_v29 = vadd.f32 %v476_v25, %v470_v24  ;;  %v3038_v58 = vld [vmem:[%s4068_s2 + $0xd4] ss:$48 sps:$4 sm:$0xff]   ;;  %v3078_v24 = vld [vmem:[%s4068_s2 + $0x80] ss:$48 sps:$4 sm:$0xff]   ;;  %v3081_v25 = vld [vmem:[%s4068_s2 + $0x88] ss:$48 sps:$4 sm:$0xff]  }
 0x11f   : > { %v3245_v30 = vpop.eup %3244  ;;  %v473_v34 = vmul.f32 %v3243_v27, %v2936_v56  ;;  %v3030_v56 = vld [vmem:[%s4068_s2 + $0x70] ss:$48 sps:$4 sm:$0xff]   ;;  %v3086_v26 = vld [vmem:[%s4068_s2 + $0xe4] ss:$48 sps:$4 sm:$0xff]   ;;  %v3089_v27 = vld [vmem:[%s4068_s2 + $0xec] ss:$48 sps:$4 sm:$0xff]  }
 0x120   : > { %v478_v31 = vadd.f32 %v477_v29, %v471_v28  ;;  %v472_v32 = vmul.f32 %v3245_v30, %v407_v62  ;;  %v3247_v33 = vpop.eup %3246  ;;  %v3044_v62 = vld [vmem:[%s4068_s2 + $0x134] ss:$48 sps:$4 sm:$0xff]   ;;  %v3084_v28 = vld [vmem:[%s4068_s2 + $0xe0] ss:$48 sps:$4 sm:$0xff]   ;;  %v3087_v29 = vld [vmem:[%s4068_s2 + $0xe8] ss:$48 sps:$4 sm:$0xff]  }
 0x121   : > { %v474_v36 = vmul.f32 %v3247_v33, %v2937_v60  ;;  %v3036_v60 = vld [vmem:[%s4068_s2 + $0xd0] ss:$48 sps:$4 sm:$0xff]   ;;  %v3092_v30 = vld [vmem:[%s4068_s2 + $0x144] ss:$48 sps:$4 sm:$0xff]  }
 0x122   : > { %v479_v35 = vadd.f32 %v478_v31, %v472_v32  ;;  %v3090_v31 = vld [vmem:[%s4068_s2 + $0x140] ss:$48 sps:$4 sm:$0xff]   ;;  %v3093_v32 = vld [vmem:[%s4068_s2 + $0x148] ss:$48 sps:$4 sm:$0xff]   ;;  %v3098_v33 = vld [vmem:[%s4068_s2 + $0x1a4] ss:$48 sps:$4 sm:$0xff]  }
 0x124   : > { %v480_v37 = vadd.f32 %v479_v35, %v473_v34  ;;  %v3101_v34 = vld [vmem:[%s4068_s2 + $0x1ac] ss:$48 sps:$4 sm:$0xff]   ;;  %v3096_v35 = vld [vmem:[%s4068_s2 + $0x1a0] ss:$48 sps:$4 sm:$0xff]  }
 0x126   : > { %v481_v38 = vadd.f32 %v480_v37, %v474_v36  ;;  %v3099_v36 = vld [vmem:[%s4068_s2 + $0x1a8] ss:$48 sps:$4 sm:$0xff]   ;;  %v3104_v37 = vld [vmem:[%s4068_s2 + $0x204] ss:$48 sps:$4 sm:$0xff]  }
 0x128   : > { %v482_v39 = vrot.slane %v481_v38, 4 }
 0x12a   : > { %v483_v40 = vadd.f32 %v482_v39, %v481_v38  ;;  %v3107_v38 = vld [vmem:[%s4068_s2 + $0x20c] ss:$48 sps:$4 sm:$0xff]   ;;  %v3102_v39 = vld [vmem:[%s4068_s2 + $0x200] ss:$48 sps:$4 sm:$0xff]  }
 0x12c   : > { %v484_v41 = vrot.slane %v483_v40, 2 }
 0x12e   : > { %v485_v42 = vadd.f32 %v484_v41, %v483_v40  ;;  %v3105_v40 = vld [vmem:[%s4068_s2 + $0x208] ss:$48 sps:$4 sm:$0xff]   ;;  %v3110_v41 = vld [vmem:[%s4068_s2 + $0x264] ss:$48 sps:$4 sm:$0xff]  }
 0x130   : > { %v486_v44 = vrot.slane %v485_v42, 1 }
 0x132   : > { %v487_v46 = vadd.f32 %v486_v44, %v485_v42  ;;  %v3113_v42 = vld [vmem:[%s4068_s2 + $0x26c] ss:$48 sps:$4 sm:$0xff]   ;;  %v3108_v44 = vld [vmem:[%s4068_s2 + $0x260] ss:$48 sps:$4 sm:$0xff]  }
 0x134   : > { %v489_v47 = vadd.f32 %v488_v45, %v487_v46  ;;  %v3111_v45 = vld [vmem:[%s4068_s2 + $0x268] ss:$48 sps:$4 sm:$0xff]   ;;  %v3116_v46 = vld [vmem:[%s4068_s2 + $0x2c4] ss:$48 sps:$4 sm:$0xff]  }
 0x136   : > { %490 = vst [vmem:[#allocation2] sm:$0x1] %v489_v47  ;;  %v3119_v47 = vld [vmem:[%s4068_s2 + $0x2cc] ss:$48 sps:$4 sm:$0xff]  }
 0x13d   : > { %v494_v48 = vld [vmem:[#allocation2] sm:$0x1] }
 0x13e   : > { %v495_v49 = vmul.f32 0.015625, %v494_v48  ;;  %v3114_v48 = vld [vmem:[%s4068_s2 + $0x2c0] ss:$48 sps:$4 sm:$0xff]  }
 0x140   : > { %v3518_v53 = vpack.c.bf16 %v495_v49, %v495_v49  ;;  %v3117_v49 = vld [vmem:[%s4068_s2 + $0x2c8] ss:$48 sps:$4 sm:$0xff]  }
 0x142   : > { %2642 = vmatmul.mubr.msk.bf16.vlgmr.msra.gmra.mrb[0].mxu1 %vm3514_vm1, %v3518_v53  ;;  %2645 = vmatmul.mubr.msk.bf16.vlgmr.msra.gmra.mrb[8].mxu0 %vm3514_vm1, %v3518_v53 }
 0x143   : > { %1158 = vmatpush1.bf16.msra.mxu1 %v3024_v50  ;;  %1199 = vmatpush1.bf16.msra.mxu0 %v3027_v51  ;;  %v3120_v50 = vld [vmem:[%s4069_s3 + $0x40] sm:$0xff]  }
 0x144   : > { %1159 = vmatprep.subr.bf16.mxu1 %v3032_v54  ;;  %1200 = vmatprep.subr.bf16.mxu0 %v3035_v55  ;;  %v3121_v51 = vld [vmem:[%s4069_s3 + $0xc0] sm:$0xff]  }
 0x145   : > { %1189 = vmatprep.mubr.bf16.mxu1 %v3325_v43  ;;  %1230 = vmatprep.mubr.bf16.mxu0 %v3325_v43  ;;  %v3122_v54 = vld [vmem:[%s4069_s3] sm:$0xff]  }
 0x146   : > { %v3123_v55 = vld [vmem:[%s4069_s3 + $0x80] sm:$0xff]  }
 0x147   : > { %1160 = vmatpush1.bf16.msra.mxu1 %v3030_v56  ;;  %1201 = vmatpush1.bf16.msra.mxu0 %v3033_v57  ;;  %v3126_v56 = vld [vmem:[%s4069_s3 + $0x8] sm:$0xff]  }
 0x148   : > { %1161 = vmatprep.subr.bf16.mxu1 %v3038_v58  ;;  %1202 = vmatprep.subr.bf16.mxu0 %v3041_v59  ;;  %v3127_v57 = vld [vmem:[%s4069_s3 + $0x88] sm:$0xff]   ;;  %v3128_v58 = vld [vmem:[%s4069_s3 + $0x50] sm:$0xff]  }
 0x149   : > { %v3129_v59 = vld [vmem:[%s4069_s3 + $0xd0] sm:$0xff]  }
 0x14b   : > { %1162 = vmatpush1.bf16.msra.mxu1 %v3036_v60  ;;  %1203 = vmatpush1.bf16.msra.mxu0 %v3039_v61  ;;  %v3130_v60 = vld [vmem:[%s4069_s3 + $0x10] sm:$0xff]  }
 0x14c   : > { %1163 = vmatprep.subr.bf16.mxu1 %v3044_v62  ;;  %1204 = vmatprep.subr.bf16.mxu0 %v3047_v63  ;;  %v3131_v61 = vld [vmem:[%s4069_s3 + $0x90] sm:$0xff]   ;;  %v3132_v62 = vld [vmem:[%s4069_s3 + $0x58] sm:$0xff]  }
 0x14d   : > { %v3133_v63 = vld [vmem:[%s4069_s3 + $0xd8] sm:$0xff]  }
 0x14f   : > { %1164 = vmatpush1.bf16.msra.mxu1 %v3042_v0  ;;  %1205 = vmatpush1.bf16.msra.mxu0 %v3045_v1  ;;  %v3134_v0 = vld [vmem:[%s4069_s3 + $0x18] sm:$0xff]  }
 0x150   : > { %1165 = vmatprep.subr.bf16.mxu1 %v3050_v2  ;;  %1206 = vmatprep.subr.bf16.mxu0 %v3053_v3  ;;  %v3135_v1 = vld [vmem:[%s4069_s3 + $0x98] sm:$0xff]   ;;  %v3136_v2 = vld [vmem:[%s4069_s3 + $0x60] sm:$0xff]  }
 0x151   : > { %v3137_v3 = vld [vmem:[%s4069_s3 + $0xe0] sm:$0xff]  }
 0x153   : > { %1166 = vmatpush1.bf16.msra.mxu1 %v3048_v4  ;;  %1207 = vmatpush1.bf16.msra.mxu0 %v3051_v5  ;;  %v3138_v4 = vld [vmem:[%s4069_s3 + $0x20] sm:$0xff]  }
 0x154   : > { %1167 = vmatprep.subr.bf16.mxu1 %v3056_v6  ;;  %1208 = vmatprep.subr.bf16.mxu0 %v3059_v7  ;;  %v3139_v5 = vld [vmem:[%s4069_s3 + $0xa0] sm:$0xff]   ;;  %v3140_v6 = vld [vmem:[%s4069_s3 + $0x68] sm:$0xff]  }
 0x155   : > { %v3141_v7 = vld [vmem:[%s4069_s3 + $0xe8] sm:$0xff]  }
 0x157   : > { %1168 = vmatpush1.bf16.msra.mxu1 %v3054_v8  ;;  %1209 = vmatpush1.bf16.msra.mxu0 %v3057_v9  ;;  %v3142_v8 = vld [vmem:[%s4069_s3 + $0x28] sm:$0xff]  }
 0x158   : > { %1169 = vmatprep.subr.bf16.mxu1 %v3062_v10  ;;  %1210 = vmatprep.subr.bf16.mxu0 %v3065_v11  ;;  %v3143_v9 = vld [vmem:[%s4069_s3 + $0xa8] sm:$0xff]   ;;  %v3144_v10 = vld [vmem:[%s4069_s3 + $0x70] sm:$0xff]  }
 0x159   : > { %v3145_v11 = vld [vmem:[%s4069_s3 + $0xf0] sm:$0xff]  }
 0x15b   : > { %1170 = vmatpush1.bf16.msra.mxu1 %v3060_v12  ;;  %1211 = vmatpush1.bf16.msra.mxu0 %v3063_v13  ;;  %v3146_v12 = vld [vmem:[%s4069_s3 + $0x30] sm:$0xff]  }
 0x15c   : > { %1171 = vmatprep.subr.bf16.mxu1 %v3068_v14  ;;  %1212 = vmatprep.subr.bf16.mxu0 %v3071_v15  ;;  %v3147_v13 = vld [vmem:[%s4069_s3 + $0xb0] sm:$0xff]   ;;  %v3148_v14 = vld [vmem:[%s4069_s3 + $0x78] sm:$0xff]  }
 0x15d   : > { %v3149_v15 = vld [vmem:[%s4069_s3 + $0xf8] sm:$0xff]  }
 0x15f   : > { %1172 = vmatpush1.bf16.msra.mxu1 %v3066_v16  ;;  %1213 = vmatpush1.bf16.msra.mxu0 %v3069_v17  ;;  %v3150_v16 = vld [vmem:[%s4069_s3 + $0x38] sm:$0xff]  }
 0x160   : > { %1239 = vmatprep.subr.bf16.mxu1 %v3074_v18  ;;  %1280 = vmatprep.subr.bf16.mxu0 %v3077_v19  ;;  %v3151_v17 = vld [vmem:[%s4069_s3 + $0xb8] sm:$0xff]   ;;  %v3152_v18 = vld [vmem:[%s4069_s3 + $0x140] sm:$0xff]  }
 0x161   : > { %v3153_v19 = vld [vmem:[%s4069_s3 + $0x1c0] sm:$0xff]  }
 0x162   : > { %2648 = vmatmul.mubr.msk.bf16.vlgmr.msra.gmra.mrb[4].mxu1 %vm3514_vm1, %v3518_v53  ;;  %2651 = vmatmul.mubr.msk.bf16.vlgmr.msra.gmra.mrb[12].mxu0 %vm3514_vm1, %v3518_v53 }
 0x163   : > { %1240 = vmatpush1.bf16.msra.mxu1 %v3072_v20  ;;  %1281 = vmatpush1.bf16.msra.mxu0 %v3075_v21 }
 0x164   : > { %1241 = vmatprep.subr.bf16.mxu1 %v3080_v22  ;;  %1282 = vmatprep.subr.bf16.mxu0 %v3083_v23 }
 0x165   : > { %1271 = vmatprep.mubr.bf16.mxu1 %v3325_v43  ;;  %1312 = vmatprep.mubr.bf16.mxu0 %v3325_v43  ;;  %v3095_v43 = vld [vmem:[%s4068_s2 + $0x14c] ss:$48 sps:$4 sm:$0xff]  }
 0x167   : > { %1242 = vmatpush1.bf16.msra.mxu1 %v3078_v24  ;;  %1283 = vmatpush1.bf16.msra.mxu0 %v3081_v25 }
 0x168   : > { %1243 = vmatprep.subr.bf16.mxu1 %v3086_v26  ;;  %1284 = vmatprep.subr.bf16.mxu0 %v3089_v27 }
 0x16b   : > { %1244 = vmatpush1.bf16.msra.mxu1 %v3084_v28  ;;  %1285 = vmatpush1.bf16.msra.mxu0 %v3087_v29 }
 0x16c   : > { %1245 = vmatprep.subr.bf16.mxu1 %v3092_v30  ;;  %1286 = vmatprep.subr.bf16.mxu0 %v3095_v43 }
 0x16f   : > { %1246 = vmatpush1.bf16.msra.mxu1 %v3090_v31  ;;  %1287 = vmatpush1.bf16.msra.mxu0 %v3093_v32 }
 0x170   : > { %1247 = vmatprep.subr.bf16.mxu1 %v3098_v33  ;;  %1288 = vmatprep.subr.bf16.mxu0 %v3101_v34 }
 0x173   : > { %1248 = vmatpush1.bf16.msra.mxu1 %v3096_v35  ;;  %1289 = vmatpush1.bf16.msra.mxu0 %v3099_v36 }
 0x174   : > { %1249 = vmatprep.subr.bf16.mxu1 %v3104_v37  ;;  %1290 = vmatprep.subr.bf16.mxu0 %v3107_v38 }
 0x177   : > { %1250 = vmatpush1.bf16.msra.mxu1 %v3102_v39  ;;  %1291 = vmatpush1.bf16.msra.mxu0 %v3105_v40 }
 0x178   : > { %1251 = vmatprep.subr.bf16.mxu1 %v3110_v41  ;;  %1292 = vmatprep.subr.bf16.mxu0 %v3113_v42 }
 0x17b   : > { %1252 = vmatpush1.bf16.msra.mxu1 %v3108_v44  ;;  %1293 = vmatpush1.bf16.msra.mxu0 %v3111_v45 }
 0x17c   : > { %1253 = vmatprep.subr.bf16.mxu1 %v3116_v46  ;;  %1294 = vmatprep.subr.bf16.mxu0 %v3119_v47 }
 0x17f   : > { %1254 = vmatpush1.bf16.msra.mxu1 %v3114_v48  ;;  %1295 = vmatpush1.bf16.msra.mxu0 %v3117_v49  ;;  %v3154_v49 = vld [vmem:[%s4069_s3 + $0x100] sm:$0xff]  }
 0x180   : > { %2782 = vmatprep.subr.bf16.mxu1 %v3120_v50  ;;  %2804 = vmatprep.subr.bf16.mxu0 %v3121_v51 }
 0x182   : > { %2654 = vmatmul.mubr.msk.bf16.vlgmr.msra.gmra.mrb[8].mxu1 %vm3514_vm1, %v3518_v53  ;;  %2657 = vmatmul.mubr.msk.bf16.vlgmr.msra.gmra.mrb[16].mxu0 %vm3514_vm1, %v3518_v53  ;;  %v3125_v53 = vld [vmem:[%s4069_s3 + $0xc8] sm:$0xff]  }
 0x183   : > { %2783 = vmatpush3.bf16.msra.mxu1 %v3122_v54  ;;  %2805 = vmatpush3.bf16.msra.mxu0 %v3123_v55 }
 0x184   : > { %2784 = vmatprep.subr.bf16.mxu1 %v3124_v52  ;;  %2806 = vmatprep.subr.bf16.mxu0 %v3125_v53  ;;  %v3155_v52 = vld [vmem:[%s4069_s3 + $0x180] sm:$0xff]   ;;  %v3156_v53 = vld [vmem:[%s4069_s3 + $0x148] sm:$0xff]  }
 0x187   : > { %2785 = vmatpush3.bf16.msra.mxu1 %v3126_v56  ;;  %2807 = vmatpush3.bf16.msra.mxu0 %v3127_v57  ;;  %v3157_v56 = vld [vmem:[%s4069_s3 + $0x1c8] sm:$0xff]  }
 0x188   : > { %2786 = vmatprep.subr.bf16.mxu1 %v3128_v58  ;;  %2808 = vmatprep.subr.bf16.mxu0 %v3129_v59 }
 0x18b   : > { %2787 = vmatpush3.bf16.msra.mxu1 %v3130_v60  ;;  %2809 = vmatpush3.bf16.msra.mxu0 %v3131_v61 }
 0x18c   : > { %2788 = vmatprep.subr.bf16.mxu1 %v3132_v62  ;;  %2810 = vmatprep.subr.bf16.mxu0 %v3133_v63 }
 0x18f   : > { %2789 = vmatpush3.bf16.msra.mxu1 %v3134_v0  ;;  %2811 = vmatpush3.bf16.msra.mxu0 %v3135_v1 }
 0x190   : > { %2790 = vmatprep.subr.bf16.mxu1 %v3136_v2  ;;  %2812 = vmatprep.subr.bf16.mxu0 %v3137_v3 }
 0x193   : > { %2791 = vmatpush3.bf16.msra.mxu1 %v3138_v4  ;;  %2813 = vmatpush3.bf16.msra.mxu0 %v3139_v5  ;;  %v3158_v4 = vld [vmem:[%s4069_s3 + $0x108] sm:$0xff]  }
 0x194   : > { %2792 = vmatprep.subr.bf16.mxu1 %v3140_v6  ;;  %2814 = vmatprep.subr.bf16.mxu0 %v3141_v7  ;;  %v3159_v5 = vld [vmem:[%s4069_s3 + $0x188] sm:$0xff]   ;;  %v3160_v6 = vld [vmem:[%s4069_s3 + $0x150] sm:$0xff]  }
 0x195   : > { %v3161_v7 = vld [vmem:[%s4069_s3 + $0x1d0] sm:$0xff]  }
 0x197   : > { %2793 = vmatpush3.bf16.msra.mxu1 %v3142_v8  ;;  %2815 = vmatpush3.bf16.msra.mxu0 %v3143_v9  ;;  %v3162_v8 = vld [vmem:[%s4069_s3 + $0x110] sm:$0xff]  }
 0x198   : > { %2794 = vmatprep.subr.bf16.mxu1 %v3144_v10  ;;  %2816 = vmatprep.subr.bf16.mxu0 %v3145_v11  ;;  %v3163_v9 = vld [vmem:[%s4069_s3 + $0x190] sm:$0xff]   ;;  %v3164_v10 = vld [vmem:[%s4069_s3 + $0x158] sm:$0xff]  }
 0x199   : > { %v3165_v11 = vld [vmem:[%s4069_s3 + $0x1d8] sm:$0xff]  }
 0x19b   : > { %2795 = vmatpush3.bf16.msra.mxu1 %v3146_v12  ;;  %2817 = vmatpush3.bf16.msra.mxu0 %v3147_v13  ;;  %v3166_v12 = vld [vmem:[%s4069_s3 + $0x118] sm:$0xff]  }
 0x19c   : > { %2796 = vmatprep.subr.bf16.mxu1 %v3148_v14  ;;  %2818 = vmatprep.subr.bf16.mxu0 %v3149_v15  ;;  %v3167_v13 = vld [vmem:[%s4069_s3 + $0x198] sm:$0xff]   ;;  %v3168_v14 = vld [vmem:[%s4069_s3 + $0x160] sm:$0xff]  }
 0x19f   : > { %2797 = vmatpush3.bf16.msra.mxu1 %v3150_v16  ;;  %2819 = vmatpush3.bf16.msra.mxu0 %v3151_v17  ;;  %v3169_v16 = vld [vmem:[%s4069_s3 + $0x1e0] sm:$0xff]  }
 0x1a0   : > { %2826 = vmatprep.subr.bf16.mxu1 %v3152_v18  ;;  %2848 = vmatprep.subr.bf16.mxu0 %v3153_v19 }
 0x215   : > { %v1109_v20 = vpop.f32.mrb[0].mxu1  ;;  %v1150_v21 = vpop.f32.mrb[8].mxu0 }
 0x216   : > { %v2658_v22 = vmul.f32 -1.442695, %v1109_v20  ;;  %v2660_v23 = vmul.f32 -1.442695, %v1150_v21  ;;  %v1111_v24 = vpop.f32.mrb[1].mxu1  ;;  %v1152_v25 = vpop.f32.mrb[9].mxu0 }
 0x217   : > { %v2659_v26 = vmul.f32 -1.442695, %v1111_v24  ;;  %v2661_v27 = vmul.f32 -1.442695, %v1152_v25  ;;  %v1113_v28 = vpop.f32.mrb[2].mxu1  ;;  %v1154_v29 = vpop.f32.mrb[10].mxu0 }
 0x218   : > { %3248 = vpow2.f32 %v2658_v22  ;;  %v1114_v30 = vpop.f32.mrb[3].mxu1  ;;  %v1155_v43 = vpop.f32.mrb[11].mxu0  ;;  %v3174_v28 = vld [vmem:[%s4069_s3 + $0x128] sm:$0xff]  }
 0x219   : > { %3250 = vpow2.f32 %v2660_v23  ;;  %v3175_v29 = vld [vmem:[%s4069_s3 + $0x1a8] sm:$0xff]   ;;  %v3176_v30 = vld [vmem:[%s4069_s3 + $0x170] sm:$0xff]  }
 0x21a   : > { %3252 = vpow2.f32 %v2659_v26  ;;  %v3177_v43 = vld [vmem:[%s4069_s3 + $0x1f0] sm:$0xff]  }
 0x21b   : > { %3254 = vpow2.f32 %v2661_v27  ;;  %v3173_v27 = vld [vmem:[%s4069_s3 + $0x1e8] sm:$0xff]  }
 0x222   : > { %v3249_v31 = vpop.eup %3248 }
 0x223   : > { %v3251_v32 = vpop.eup %3250  ;;  %v1357_v33 = vadd.f32 1.0, %v3249_v31  ;;  %v3178_v31 = vld [vmem:[%s4069_s3 + $0x130] sm:$0xff]  }
 0x224   : > { %v3253_v34 = vpop.eup %3252  ;;  %v1359_v35 = vadd.f32 1.0, %v3251_v32  ;;  %v3179_v32 = vld [vmem:[%s4069_s3 + $0x1b0] sm:$0xff]  }
 0x225   : > { %v3255_v36 = vpop.eup %3254  ;;  %3256 = vrcp.f32 %v1357_v33  ;;  %v1358_v37 = vadd.f32 1.0, %v3253_v34  ;;  %v3180_v33 = vld [vmem:[%s4069_s3 + $0x178] sm:$0xff]  }
 0x226   : > { %3258 = vrcp.f32 %v1359_v35  ;;  %v1360_v38 = vadd.f32 1.0, %v3255_v36  ;;  %v3181_v34 = vld [vmem:[%s4069_s3 + $0x1f8] sm:$0xff]  }
 0x227   : > { %3260 = vrcp.f32 %v1358_v37  ;;  %v3182_v37 = vld [vmem:[%s4069_s3 + $0x138] sm:$0xff]  }
 0x228   : > { %3262 = vrcp.f32 %v1360_v38 }
 0x22f   : > { %v3257_v39 = vpop.eup %3256 }
 0x230   : > { %v3259_v40 = vpop.eup %3258  ;;  %v1393_v42 = vmul.f32 %v3257_v39, %v1109_v20 }
 0x231   : > { %v3261_v41 = vpop.eup %3260  ;;  %v1395_v45 = vmul.f32 %v3259_v40, %v1150_v21  ;;  %v3170_v21 = vld [vmem:[%s4069_s3 + $0x120] sm:$0xff]   ;;  %v3183_v40 = vld [vmem:[%s4069_s3 + $0x1b8] sm:$0xff]  }
 0x232   : > { %v3263_v44 = vpop.eup %3262  ;;  %v1394_v46 = vmul.f32 %v3261_v41, %v1111_v24  ;;  %v1405_v50 = vpack.c.bf16 %v1393_v42, %v1393_v42  ;;  %v3171_v24 = vld [vmem:[%s4069_s3 + $0x1a0] sm:$0xff]  }
 0x233   : > { %v1396_v47 = vmul.f32 %v3263_v44, %v1152_v25  ;;  %v1407_v57 = vpack.c.bf16 %v1395_v45, %v1395_v45  ;;  %v3172_v25 = vld [vmem:[%s4069_s3 + $0x168] sm:$0xff]   ;;  %v3184_v41 = vld [vmem:[%s4069_s3 + $0x240] sm:$0xff]  }
 0x234   : > { %v1406_v48 = vpack.c.bf16 %v1394_v46, %v1394_v46  ;;  %v3185_v46 = vld [vmem:[%s4069_s3 + $0x2c0] sm:$0xff]  }
 0x235   : > { %v1408_v51 = vpack.c.bf16 %v1396_v47, %v1396_v47  ;;  %v3827_v54 = vpop.f32.mrb[4].mxu1  ;;  %v3829_v55 = vpop.f32.mrb[12].mxu0 }
 0x236   : > { %v2662_v58 = vmul.f32 -1.442695, %v3827_v54  ;;  %v2664_v59 = vmul.f32 -1.442695, %v3829_v55  ;;  %v3842_v60 = vpop.f32.mrb[5].mxu1  ;;  %v3844_v61 = vpop.f32.mrb[13].mxu0  ;;  %2224 = vmatprep.mubr.bf16.mxu1 %v1406_v48 }
 0x237   : > { %v2663_v62 = vmul.f32 -1.442695, %v3842_v60  ;;  %v2665_v63 = vmul.f32 -1.442695, %v3844_v61  ;;  %2264 = vmatprep.mubr.bf16.mxu0 %v1408_v51  ;;  %v1195_v0 = vpop.f32.mrb[6].mxu1  ;;  %v1236_v1 = vpop.f32.mrb[14].mxu0  ;;  %2225 = vmatmul.mubr.bf16.vlgmr.msra.gmra.mrb[12].mxu1 %v1405_v50 }
 0x238   : > { %3264 = vpow2.f32 %v2662_v58  ;;  %2265 = vmatmul.mubr.bf16.vlgmr.msra.gmra.mrb[20].mxu0 %v1407_v57  ;;  %2827 = vmatpush3.bf16.msra.mxu1 %v3154_v49  ;;  %v1196_v2 = vpop.f32.mrb[7].mxu1  ;;  %v1237_v3 = vpop.f32.mrb[15].mxu0  ;;  %v3186_v49 = vld [vmem:[%s4069_s3 + $0x200] sm:$0xff]  }
 0x239   : > { %3266 = vpow2.f32 %v2664_v59  ;;  %2849 = vmatpush3.bf16.msra.mxu0 %v3155_v52  ;;  %2828 = vmatprep.subr.bf16.mxu1 %v3156_v53  ;;  %v3187_v52 = vld [vmem:[%s4069_s3 + $0x280] sm:$0xff]   ;;  %v3188_v53 = vld [vmem:[%s4069_s3 + $0x248] sm:$0xff]  }
 0x23a   : > { %3268 = vpow2.f32 %v2663_v62  ;;  %2850 = vmatprep.subr.bf16.mxu0 %v3157_v56  ;;  %v3189_v56 = vld [vmem:[%s4069_s3 + $0x2c8] sm:$0xff]  }
 0x23b   : > { %3270 = vpow2.f32 %v2665_v63 }
 0x23c   : > { %2829 = vmatpush3.bf16.msra.mxu1 %v3158_v4  ;;  %v3190_v4 = vld [vmem:[%s4069_s3 + $0x208] sm:$0xff]  }
 0x23d   : > { %2851 = vmatpush3.bf16.msra.mxu0 %v3159_v5  ;;  %2830 = vmatprep.subr.bf16.mxu1 %v3160_v6  ;;  %v3191_v5 = vld [vmem:[%s4069_s3 + $0x288] sm:$0xff]   ;;  %v3192_v6 = vld [vmem:[%s4069_s3 + $0x250] sm:$0xff]  }
 0x23e   : > { %2852 = vmatprep.subr.bf16.mxu0 %v3161_v7  ;;  %v3193_v7 = vld [vmem:[%s4069_s3 + $0x2d0] sm:$0xff]  }
 0x240   : > { %2831 = vmatpush3.bf16.msra.mxu1 %v3162_v8  ;;  %v3194_v8 = vld [vmem:[%s4069_s3 + $0x210] sm:$0xff]  }
 0x241   : > { %2853 = vmatpush3.bf16.msra.mxu0 %v3163_v9  ;;  %2832 = vmatprep.subr.bf16.mxu1 %v3164_v10  ;;  %v3195_v9 = vld [vmem:[%s4069_s3 + $0x290] sm:$0xff]   ;;  %v3196_v10 = vld [vmem:[%s4069_s3 + $0x258] sm:$0xff]  }
 0x242   : > { %v3265_v15 = vpop.eup %3264  ;;  %2854 = vmatprep.subr.bf16.mxu0 %v3165_v11  ;;  %v3197_v11 = vld [vmem:[%s4069_s3 + $0x2d8] sm:$0xff]  }
 0x243   : > { %v3267_v17 = vpop.eup %3266  ;;  %v1361_v18 = vadd.f32 1.0, %v3265_v15 }
 0x244   : > { %v3269_v19 = vpop.eup %3268  ;;  %v1363_v20 = vadd.f32 1.0, %v3267_v17  ;;  %2833 = vmatpush3.bf16.msra.mxu1 %v3166_v12  ;;  %v3198_v12 = vld [vmem:[%s4069_s3 + $0x218] sm:$0xff]  }
 0x245   : > { %v3271_v22 = vpop.eup %3270  ;;  %3272 = vrcp.f32 %v1361_v18  ;;  %v1362_v23 = vadd.f32 1.0, %v3269_v19  ;;  %2855 = vmatpush3.bf16.msra.mxu0 %v3167_v13  ;;  %2834 = vmatprep.subr.bf16.mxu1 %v3168_v14  ;;  %v3199_v13 = vld [vmem:[%s4069_s3 + $0x298] sm:$0xff]   ;;  %v3200_v14 = vld [vmem:[%s4069_s3 + $0x260] sm:$0xff]  }
 0x246   : > { %3274 = vrcp.f32 %v1363_v20  ;;  %v1364_v26 = vadd.f32 1.0, %v3271_v22  ;;  %2856 = vmatprep.subr.bf16.mxu0 %v3169_v16  ;;  %v3201_v16 = vld [vmem:[%s4069_s3 + $0x2e0] sm:$0xff]  }
 0x247   : > { %3276 = vrcp.f32 %v1362_v23 }
 0x248   : > { %3278 = vrcp.f32 %v1364_v26  ;;  %2835 = vmatpush3.bf16.msra.mxu1 %v3170_v21  ;;  %v3202_v21 = vld [vmem:[%s4069_s3 + $0x220] sm:$0xff]  }
 0x249   : > { %2857 = vmatpush3.bf16.msra.mxu0 %v3171_v24  ;;  %2836 = vmatprep.subr.bf16.mxu1 %v3172_v25  ;;  %v3203_v24 = vld [vmem:[%s4069_s3 + $0x2a0] sm:$0xff]   ;;  %v3204_v25 = vld [vmem:[%s4069_s3 + $0x268] sm:$0xff]  }
 0x24a   : > { %2858 = vmatprep.subr.bf16.mxu0 %v3173_v27  ;;  %v3205_v27 = vld [vmem:[%s4069_s3 + $0x2e8] sm:$0xff]  }
 0x24c   : > { %2837 = vmatpush3.bf16.msra.mxu1 %v3174_v28  ;;  %v3206_v28 = vld [vmem:[%s4069_s3 + $0x228] sm:$0xff]  }
 0x24d   : > { %2859 = vmatpush3.bf16.msra.mxu0 %v3175_v29  ;;  %2838 = vmatprep.subr.bf16.mxu1 %v3176_v30  ;;  %v3207_v29 = vld [vmem:[%s4069_s3 + $0x2a8] sm:$0xff]   ;;  %v3208_v30 = vld [vmem:[%s4069_s3 + $0x270] sm:$0xff]  }
 0x24e   : > { %2860 = vmatprep.subr.bf16.mxu0 %v3177_v43  ;;  %v3209_v43 = vld [vmem:[%s4069_s3 + $0x2f0] sm:$0xff]  }
 0x24f   : > { %v3273_v35 = vpop.eup %3272 }
 0x250   : > { %v3275_v36 = vpop.eup %3274  ;;  %2839 = vmatpush3.bf16.msra.mxu1 %v3178_v31  ;;  %v1397_v39 = vmul.f32 %v3273_v35, %v3827_v54  ;;  %v3210_v31 = vld [vmem:[%s4069_s3 + $0x230] sm:$0xff]  }
 0x251   : > { %v3277_v38 = vpop.eup %3276  ;;  %2861 = vmatpush3.bf16.msra.mxu0 %v3179_v32  ;;  %2840 = vmatprep.subr.bf16.mxu1 %v3180_v33  ;;  %v1399_v44 = vmul.f32 %v3275_v36, %v3829_v55  ;;  %v3211_v32 = vld [vmem:[%s4069_s3 + $0x2b0] sm:$0xff]   ;;  %v3212_v33 = vld [vmem:[%s4069_s3 + $0x278] sm:$0xff]  }
 0x252   : > { %v3279_v42 = vpop.eup %3278  ;;  %v1398_v45 = vmul.f32 %v3277_v38, %v3842_v60  ;;  %2862 = vmatprep.subr.bf16.mxu0 %v3181_v34  ;;  %v1409_v50 = vpack.c.bf16 %v1397_v39, %v1397_v39  ;;  %v3213_v34 = vld [vmem:[%s4069_s3 + $0x2f8] sm:$0xff]  }
 0x253   : > { %v1400_v47 = vmul.f32 %v3279_v42, %v3844_v61  ;;  %v1411_v57 = vpack.c.bf16 %v1399_v44, %v1399_v44 }
 0x254   : > { %v1410_v48 = vpack.c.bf16 %v1398_v45, %v1398_v45  ;;  %2841 = vmatpush3.bf16.msra.mxu1 %v3182_v37  ;;  %v3214_v37 = vld [vmem:[%s4069_s3 + $0x238] sm:$0xff]  }
 0x255   : > { %v1412_v51 = vpack.c.bf16 %v1400_v47, %v1400_v47  ;;  %2863 = vmatpush3.bf16.msra.mxu0 %v3183_v40  ;;  %v3939_v54 = vpop.f32.mrb[8].mxu1  ;;  %v3941_v55 = vpop.f32.mrb[16].mxu0  ;;  %2870 = vmatprep.subr.bf16.mxu1 %v3184_v41  ;;  %v3215_v40 = vld [vmem:[%s4069_s3 + $0x2b8] sm:$0xff]  }
 0x256   : > { %v2666_v58 = vmul.f32 -1.442695, %v3939_v54  ;;  %v2668_v59 = vmul.f32 -1.442695, %v3941_v55  ;;  %2304 = vmatprep.mubr.bf16.mxu1 %v1410_v48  ;;  %v3954_v60 = vpop.f32.mrb[9].mxu1  ;;  %v3956_v61 = vpop.f32.mrb[17].mxu0  ;;  %2892 = vmatprep.subr.bf16.mxu0 %v3185_v46 }
 0x257   : > { %2344 = vmatprep.mubr.bf16.mxu0 %v1412_v51  ;;  %v2667_v62 = vmul.f32 -1.442695, %v3954_v60  ;;  %v2669_v63 = vmul.f32 -1.442695, %v3956_v61  ;;  %2305 = vmatmul.mubr.bf16.vlgmr.msra.gmra.mrb[16].mxu1 %v1409_v50  ;;  %v1277_v0 = vpop.f32.mrb[10].mxu1  ;;  %v1318_v1 = vpop.f32.mrb[18].mxu0 }
 0x258   : > { %3280 = vpow2.f32 %v2666_v58  ;;  %2345 = vmatmul.mubr.bf16.vlgmr.msra.gmra.mrb[24].mxu0 %v1411_v57  ;;  %2871 = vmatpush3.bf16.msra.mxu1 %v3186_v49  ;;  %v1278_v2 = vpop.f32.mrb[11].mxu1  ;;  %v1319_v3 = vpop.f32.mrb[19].mxu0 }
 0x259   : > { %3282 = vpow2.f32 %v2668_v59  ;;  %2893 = vmatpush3.bf16.msra.mxu0 %v3187_v52  ;;  %2872 = vmatprep.subr.bf16.mxu1 %v3188_v53 }
 0x25a   : > { %3284 = vpow2.f32 %v2667_v62  ;;  %2894 = vmatprep.subr.bf16.mxu0 %v3189_v56 }
 0x25b   : > { %3286 = vpow2.f32 %v2669_v63 }
 0x25c   : > { %2873 = vmatpush3.bf16.msra.mxu1 %v3190_v4 }
 0x25d   : > { %2895 = vmatpush3.bf16.msra.mxu0 %v3191_v5  ;;  %2874 = vmatprep.subr.bf16.mxu1 %v3192_v6 }
 0x25e   : > { %2896 = vmatprep.subr.bf16.mxu0 %v3193_v7 }
 0x260   : > { %2875 = vmatpush3.bf16.msra.mxu1 %v3194_v8 }
 0x261   : > { %2897 = vmatpush3.bf16.msra.mxu0 %v3195_v9  ;;  %2876 = vmatprep.subr.bf16.mxu1 %v3196_v10 }
 0x262   : > { %v3281_v15 = vpop.eup %3280  ;;  %2898 = vmatprep.subr.bf16.mxu0 %v3197_v11  ;;  %v2432_v11 = vlaneseq }
 0x263   : > { %v3283_v17 = vpop.eup %3282  ;;  %v1365_v18 = vadd.f32 1.0, %v3281_v15 }
 0x264   : > { %v3285_v19 = vpop.eup %3284  ;;  %v1367_v20 = vadd.f32 1.0, %v3283_v17  ;;  %2877 = vmatpush3.bf16.msra.mxu1 %v3198_v12  ;;  %v2433_v12 = vand.u32 127, %v2432_v11 }
 0x265   : > { %v3287_v22 = vpop.eup %3286  ;;  %3288 = vrcp.f32 %v1365_v18  ;;  %v1366_v23 = vadd.f32 1.0, %v3285_v19  ;;  %2899 = vmatpush3.bf16.msra.mxu0 %v3199_v13  ;;  %2878 = vmatprep.subr.bf16.mxu1 %v3200_v14 }
 0x266   : > { %3290 = vrcp.f32 %v1367_v20  ;;  %v1368_v26 = vadd.f32 1.0, %v3287_v22  ;;  %2900 = vmatprep.subr.bf16.mxu0 %v3201_v16  ;;  %vm2434_vm2 = vcmp.ge.s32.totalorder %v2433_v12, 48  ;;  %vm2435_vm3 = vcmp.lt.s32.totalorder %v2433_v12, 51 }
 0x267   : > { %3292 = vrcp.f32 %v1366_v23  ;;  %vm4045_vm4 = vmand %vm2434_vm2, %vm2435_vm3 }
 0x268   : > { %3294 = vrcp.f32 %v1368_v26  ;;  %2879 = vmatpush3.bf16.msra.mxu1 %v3202_v21 }
 0x269   : > { %2901 = vmatpush3.bf16.msra.mxu0 %v3203_v24  ;;  %2880 = vmatprep.subr.bf16.mxu1 %v3204_v25 }
 0x26a   : > { %2902 = vmatprep.subr.bf16.mxu0 %v3205_v27 }
 0x26c   : > { %2881 = vmatpush3.bf16.msra.mxu1 %v3206_v28 }
 0x26d   : > { %2903 = vmatpush3.bf16.msra.mxu0 %v3207_v29  ;;  %2882 = vmatprep.subr.bf16.mxu1 %v3208_v30 }
 0x26e   : > { %2904 = vmatprep.subr.bf16.mxu0 %v3209_v43 }
 0x26f   : > { %v3289_v35 = vpop.eup %3288 }
 0x270   : > { %v3291_v36 = vpop.eup %3290  ;;  %2883 = vmatpush3.bf16.msra.mxu1 %v3210_v31  ;;  %v1401_v39 = vmul.f32 %v3289_v35, %v3939_v54  ;;  %v2670_v54 = vld [vmem:[%s4070_s4] ss:$0 sm:$0xff] }
 0x271   : > { %v3293_v38 = vpop.eup %3292  ;;  %2905 = vmatpush3.bf16.msra.mxu0 %v3211_v32  ;;  %2884 = vmatprep.subr.bf16.mxu1 %v3212_v33  ;;  %v1403_v42 = vmul.f32 %v3291_v36, %v3941_v55 }
 0x272   : > { %v3295_v41 = vpop.eup %3294  ;;  %v1402_v44 = vmul.f32 %v3293_v38, %v3954_v60  ;;  %2906 = vmatprep.subr.bf16.mxu0 %v3213_v34  ;;  %v1413_v47 = vpack.c.bf16 %v1401_v39, %v1401_v39 }
 0x273   : > { %v1404_v45 = vmul.f32 %v3295_v41, %v3956_v61  ;;  %v1415_v49 = vpack.c.bf16 %v1403_v42, %v1403_v42 }
 0x274   : > { %v1414_v46 = vpack.c.bf16 %v1402_v44, %v1402_v44  ;;  %2885 = vmatpush3.bf16.msra.mxu1 %v3214_v37 }
 0x275   : > { %v1416_v48 = vpack.c.bf16 %v1404_v45, %v1404_v45  ;;  %2907 = vmatpush3.bf16.msra.mxu0 %v3215_v40 }
 0x276   : > { %2384 = vmatprep.mubr.bf16.mxu1 %v1414_v46 }
 0x277   : > { %2424 = vmatprep.mubr.bf16.mxu0 %v1416_v48  ;;  %2385 = vmatmul.mubr.bf16.vlgmr.msra.gmra.mrb[20].mxu1 %v1413_v47 }
 0x278   : > { %2425 = vmatmul.mubr.bf16.vlgmr.msra.gmra.mrb[28].mxu0 %v1415_v49 }
 0x30a   : > { %v2798_v50 = vpop.f32.mrb[12].mxu1 }
 0x30b   : > { %v2820_v51 = vpop.f32.mrb[20].mxu0  ;;  %v2799_v55 = vpop.f32.mrb[13].mxu1 }
 0x30c   : > { %v2800_v52 = vadd.f32 %v2799_v55, %v2798_v50  ;;  %v2821_v53 = vpop.f32.mrb[21].mxu0  ;;  %v2801_v56 = vpop.f32.mrb[14].mxu1 }
 0x30d   : > { %v2822_v57 = vadd.f32 %v2821_v53, %v2820_v51  ;;  %v2823_v58 = vpop.f32.mrb[22].mxu0  ;;  %v2802_v59 = vpop.f32.mrb[15].mxu1 }
 0x30e   : > { %v2227_v60 = vadd.f32 %v2800_v52, %v2670_v54  ;;  %v2824_v61 = vpop.f32.mrb[23].mxu0 }
 0x310   : > { %v2267_v62 = vadd.f32 %v2822_v57, %v2227_v60 }
 0x32a   : > { %v2842_v63 = vpop.f32.mrb[16].mxu1 }
 0x32b   : > { %v2864_v0 = vpop.f32.mrb[24].mxu0  ;;  %v2843_v1 = vpop.f32.mrb[17].mxu1 }
 0x32c   : > { %v2844_v2 = vadd.f32 %v2843_v1, %v2842_v63  ;;  %v2865_v3 = vpop.f32.mrb[25].mxu0  ;;  %v2845_v4 = vpop.f32.mrb[18].mxu1 }
 0x32d   : > { %v2866_v5 = vadd.f32 %v2865_v3, %v2864_v0  ;;  %v2867_v6 = vpop.f32.mrb[26].mxu0  ;;  %v2846_v7 = vpop.f32.mrb[19].mxu1 }
 0x32e   : > { %v2307_v8 = vadd.f32 %v2844_v2, %v2267_v62  ;;  %v2868_v9 = vpop.f32.mrb[27].mxu0 }
 0x330   : > { %v2347_v10 = vadd.f32 %v2866_v5, %v2307_v8 }
 0x34a   : > { %v2886_v13 = vpop.f32.mrb[20].mxu1 }
 0x34b   : > { %v2908_v14 = vpop.f32.mrb[28].mxu0  ;;  %v2887_v15 = vpop.f32.mrb[21].mxu1 }
 0x34c   : > { %v2888_v16 = vadd.f32 %v2887_v15, %v2886_v13  ;;  %v2909_v17 = vpop.f32.mrb[29].mxu0  ;;  %v2889_v18 = vpop.f32.mrb[22].mxu1 }
 0x34d   : > { %v2910_v19 = vadd.f32 %v2909_v17, %v2908_v14  ;;  %v2911_v20 = vpop.f32.mrb[30].mxu0  ;;  %v2890_v21 = vpop.f32.mrb[23].mxu1 }
 0x34e   : > { %v2387_v22 = vadd.f32 %v2888_v16, %v2347_v10  ;;  %v2912_v23 = vpop.f32.mrb[31].mxu0 }
 0x350   : > { %v2427_v25 = vadd.f32 %v2910_v19, %v2387_v22 }
 0x352   : > { %v2437_v26 = vsel %vm4045_vm4, %v2427_v25, -inf }
 0x353   : > { %2438 = vmax.xlane.f32.xlu0 %v2437_v26 }
 0x3e0   : > { %v2439_v27 = vpop.xlane.xlu0 %2438 }
 0x3e1   : > { %v2440_v28 = vsub.f32 %v2437_v26, %v2439_v27 }
 0x3e3   : > { %v2441_v29 = vmul.f32 1.442695, %v2440_v28 }
 0x3e5   : > { %3296 = vpow2.f32 %v2441_v29 }
 0x3ef   : > { %v3297_v30 = vpop.eup %3296 }
 0x3f0   : > { %2443 = vadd.xlane.f32.xlu0 %v3297_v30 }
 0x47d   : > { %v2444_v43 = vpop.xlane.xlu0 %2443 }
 0x47e   : > { %3298 = vrcp.f32 %v2444_v43 }
 0x488   : > { %v3299_v31 = vpop.eup %3298 }
 0x489   : > { %v2446_v32 = vmul.f32 %v3299_v31, %v3297_v30 }
 0x48b   : > { %v2447_v33 = vsel %vm4045_vm4, %v2446_v32, %v2427_v25 }
 0x48c   : > { %2448 = vst [vmem:[%s250_s7] sm:$0xff] %v2447_v33 }
 0x48d PF: > { %s15_s20 = sadd.s32 1, %s3322_s20   ;;  %s4076_s18 = smov %s3318_s19 }
 0x48e   : > { %p12_p5 = scmp.ge.s32.totalorder %s15_s20, 4   ;;  %s4077_s19 = smov %s4079_s21 }
 0x490   :  { %14 = sbr.rel (!%p12_p5) target bundleno = 2 (0x2), region = 78 }

</bundles_post_ra>
